<compile_context>
chip_gen: v7x
topology: tpu7x:2x2x1
jax: 0.10.0
libtpu: 0.0.40
codegen_flags: <defaults>
</compile_context>

<pallas_src>
import functools

import jax
import jax.numpy as jnp
from jax import lax
from jax.experimental import pallas as pl
from jax.experimental.pallas import tpu as pltpu


def _round_up(x, m):
    return (x + m - 1) // m * m


def _cdiv(a, b):
    return -(-a // b)


def _linear_kernel(x_ref, wt_ref, b_ref, o_ref, *, k_tail, tk):
    # x_ref : (tm, tk)  activations
    # wt_ref: (tk, tn)  W.T tile (K on sublanes, N on lanes -> native MXU matmul)
    # b_ref : (1,  tn)  bias
    # o_ref : (tm, tn)  f32 output tile; constant block index across the k axis
    #                   => VMEM-resident and used directly as the accumulator.
    k = pl.program_id(2)

    x = x_ref[...]
    w = wt_ref[...]

    if k_tail != tk:
        # Ragged K: the last K tile reads past D_in and the padded region holds
        # unspecified data. Zero BOTH operands' tails (NaN * 0 == NaN, so one
        # side is not enough). Static `if` -> zero cost when K divides evenly.
        limit = jnp.where(k == pl.num_programs(2) - 1, k_tail, tk)
        x = jnp.where(lax.broadcasted_iota(jnp.int32, x.shape, 1) < limit, x, 0)
        w = jnp.where(lax.broadcasted_iota(jnp.int32, w.shape, 0) < limit, w, 0)

    p = jnp.dot(x, w, preferred_element_type=jnp.float32)

    @pl.when(k == 0)
    def _():
        # First k step: direct write (no zero-init pass) with the bias folded in.
        o_ref[...] = p + b_ref[...]

    @pl.when(k > 0)
    def _():
        o_ref[...] += p


# VMEM budgets (conservative so the worst-case config stays well under the
# 48 MiB scoped limit we request, which itself leaves headroom on v7x's 64 MiB).
_RESIDENT_W_BYTES = 6 * 1024 * 1024     # whole weight kept VMEM-resident if <= this
_RESIDENT_TILE_BYTES = 6 * 1024 * 1024  # per-buffer cap for x / out tiles in that path
_VMEM_LIMIT_BYTES = 48 * 1024 * 1024    # > 16/32 MiB scoped defaults, < v7x physical


def multinomial_logistic_regression(x, weight, bias, *, tm=512, tn=512, tk=1024,
                                    compute_dtype=None, weight_resident=None):
    """Linear layer: x @ weight.T + bias, computed on the MXU in float32.

    x: (B, D_in); weight: (D_out, D_in) (PyTorch layout); bias: (D_out,).
    compute_dtype: optionally cast x / weight (not the accumulator) to e.g.
        jnp.bfloat16 for 2x less HBM traffic and bf16-native MXU throughput
        (result then deviates from the f32 reference beyond ~1e-5).
    weight_resident: None = auto, True/False = force/disable the single-block
        VMEM-resident weight fast path.
    """
    B, D_in = x.shape
    D_out = weight.shape[0]

    # One-time (K, N) weight layout so the MXU consumes it natively; a single
    # HBM pass over W, amortized over every M block that re-reads it.
    w_t = weight.T
    if compute_dtype is not None:
        x = x.astype(compute_dtype)
        w_t = w_t.astype(compute_dtype)
    bias2d = bias.reshape(1, D_out).astype(jnp.float32)
    itemsize = jnp.dtype(x.dtype).itemsize

    # ---- tile selection (no input padding; ragged edges handled by Pallas'
    # masked edge blocks + the in-kernel K-tail mask) -------------------------
    tm = min(tm, _round_up(B, 8))                 # sublane granularity
    if B >= 16 and _cdiv(B, tm) < 2:              # v7x megacore: >= 2 M blocks
        tm = _round_up(_cdiv(B, 2), 8)
    tn = min(tn, D_out)                           # full dim or multiple of 128
    tk = min(tk, D_in)                            # full dim or multiple of 128

    # Resident-weight fast path: single (D_in, D_out) weight block -> DMA'd
    # exactly once (block index constant over the whole grid), kernel becomes
    # one streaming pass over x.
    resident_fits = (
        D_in * D_out * itemsize <= _RESIDENT_W_BYTES
        and D_in * tm * itemsize <= _RESIDENT_TILE_BYTES     # x tile (2x buffered)
        and D_out * tm * 4 <= _RESIDENT_TILE_BYTES)          # f32 out tile
    use_resident = resident_fits if weight_resident is None else weight_resident
    if use_resident:
        tk = D_in
        tn = D_out

    grid = (_cdiv(B, tm), _cdiv(D_out, tn), _cdiv(D_in, tk))
    k_tail = D_in - (grid[2] - 1) * tk            # size of last K tile (== tk if exact)

    kernel = functools.partial(_linear_kernel, k_tail=k_tail, tk=tk)

    return pl.pallas_call(
        kernel,
        out_shape=jax.ShapeDtypeStruct((B, D_out), jnp.float32),
        grid_spec=pltpu.PrefetchScalarGridSpec(
            num_scalar_prefetch=0,
            grid=grid,
            in_specs=[
                pl.BlockSpec((tm, tk), lambda i, j, k: (i, k)),   # x tile
                pl.BlockSpec((tk, tn), lambda i, j, k: (k, j)),   # W.T tile
                pl.BlockSpec((1, tn), lambda i, j, k: (0, j)),    # bias tile
            ],
            out_specs=pl.BlockSpec((tm, tn), lambda i, j, k: (i, j)),
        ),
        compiler_params=pltpu.CompilerParams(
            dimension_semantics=("parallel", "parallel", "arbitrary"),
            vmem_limit_bytes=_VMEM_LIMIT_BYTES),
        cost_estimate=pl.CostEstimate(
            flops=2 * B * D_in * D_out,
            transcendentals=0,
            bytes_accessed=itemsize * (B * D_in + D_in * D_out)
                           + 4 * (D_out + B * D_out)),
    )(x, w_t, bias2d)


if __name__ == "__main__":
    key = jax.random.PRNGKey(0)
    kx1, kw1, kb1, kx2, kw2, kb2, kx3, kw3, kb3 = jax.random.split(key, 9)

    def torch_linear_init(kw_, kb_, d_in, d_out):
        bound = 1.0 / jnp.sqrt(jnp.float32(d_in))
        w = jax.random.uniform(kw_, (d_out, d_in), jnp.float32, -bound, bound)
        b = jax.random.uniform(kb_, (d_out,), jnp.float32, -bound, bound)
        return w, b

    # --- Test 1: tiny shapes, single block, resident-weight fast path --------
    B, D_in, D_out = 8, 32, 16
    w1, b1 = torch_linear_init(kw1, kb1, D_in, D_out)
    x1 = jax.random.normal(kx1, (B, D_in), jnp.float32)
    out1 = jax.block_until_ready(multinomial_logistic_regression(x1, w1, b1))
    ref1 = x1 @ w1.T + b1
    assert out1.shape == (B, D_out)
    assert jnp.allclose(out1, ref1, atol=1e-5, rtol=1e-5), "mismatch (small)"

    # --- Test 2: full (M,N,K) grid, ragged M/N edges + in-kernel K-tail mask -
    B2, D_in2, D_out2 = 200, 300, 260
    w2, b2 = torch_linear_init(kw2, kb2, D_in2, D_out2)
    x2 = jax.random.normal(kx2, (B2, D_in2), jnp.float32)
    out2 = jax.block_until_ready(multinomial_logistic_regression(
        x2, w2, b2, tm=128, tn=128, tk=128, weight_resident=False))
    ref2 = x2 @ w2.T + b2
    assert out2.shape == (B2, D_out2)
    assert jnp.allclose(out2, ref2, atol=1e-4, rtol=1e-4), "mismatch (tiled/ragged)"

    # --- Test 3: MNIST-like logistic regression, default tiles, 2 M blocks ---
    B3, D_in3, D_out3 = 256, 784, 10
    w3, b3 = torch_linear_init(kw3, kb3, D_in3, D_out3)
    x3 = jax.random.normal(kx3, (B3, D_in3), jnp.float32)
    out3 = jax.block_until_ready(multinomial_logistic_regression(x3, w3, b3))
    ref3 = x3 @ w3.T + b3
    assert out3.shape == (B3, D_out3)
    assert jnp.allclose(out3, ref3, atol=1e-4, rtol=1e-4), "mismatch (mnist-like)"

    # --- Test 4: bf16 operand path (f32 accumulation), relaxed tolerance -----
    out4 = jax.block_until_ready(multinomial_logistic_regression(
        x3, w3, b3, compute_dtype=jnp.bfloat16))
    assert out4.shape == (B3, D_out3)
    assert jnp.allclose(out4, ref3, atol=5e-2, rtol=5e-2), "mismatch (bf16)"

    print("KERNEL_OK")
</pallas_src>

<mosaic_0001>
module attributes {stable_mosaic.version = 11 : i64} {
  func.func @_linear_kernel(%arg0: i32, %arg1: i32, %arg2: i32, %arg3: memref<8x32xf32, #tpu.memory_space<vmem>>, %arg4: memref<32x16xf32, #tpu.memory_space<vmem>>, %arg5: memref<1x16xf32, #tpu.memory_space<vmem>>, %arg6: memref<8x16xf32, #tpu.memory_space<vmem>>) attributes {dimension_semantics = [#tpu.dimension_semantics<parallel>, #tpu.dimension_semantics<parallel>, #tpu.dimension_semantics<arbitrary>], iteration_bounds = array<i64: 1, 1, 1>, scalar_prefetch = 0 : i64, scratch_operands = 0 : i64, tpu.core_type = #tpu.core_type<tc>, window_params = [{transform_indices = @transform_0, window_bounds = array<i64: 8, 32>}, {transform_indices = @transform_1, window_bounds = array<i64: 32, 16>}, {transform_indices = @transform_2, window_bounds = array<i64: 1, 16>}, {transform_indices = @transform_3, window_bounds = array<i64: 8, 16>}]} {
    %c0 = arith.constant 0 : index
    %c0_0 = arith.constant 0 : index
    %0 = vector.load %arg3[%c0, %c0_0] : memref<8x32xf32, #tpu.memory_space<vmem>>, vector<8x32xf32>
    %c0_1 = arith.constant 0 : index
    %c0_2 = arith.constant 0 : index
    %1 = vector.load %arg4[%c0_1, %c0_2] : memref<32x16xf32, #tpu.memory_space<vmem>>, vector<32x16xf32>
    %cst = arith.constant dense<0.000000e+00> : vector<8x16xf32>
    %2 = tpu.matmul %0, %1, %cst {dimension_numbers = #tpu.dot_dimension_numbers<[1], [0], [0], [1], [0, 0, 1, 1], [], []>} : vector<8x32xf32>, vector<32x16xf32>, vector<8x16xf32> -> vector<8x16xf32>
    %c0_i32 = arith.constant 0 : i32
    %3 = arith.cmpi eq, %arg2, %c0_i32 : i32
    %4 = arith.extui %3 : i1 to i32
    %c0_i32_3 = arith.constant 0 : i32
    %5 = arith.cmpi ne, %4, %c0_i32_3 : i32
    scf.if %5 {
      %c0_6 = arith.constant 0 : index
      %c0_7 = arith.constant 0 : index
      %9 = vector.load %arg5[%c0_6, %c0_7] : memref<1x16xf32, #tpu.memory_space<vmem>>, vector<1x16xf32>
      %10 = vector.broadcast %9 : vector<1x16xf32> to vector<8x16xf32>
      %11 = arith.addf %2, %10 : vector<8x16xf32>
      %c0_8 = arith.constant 0 : index
      %c0_9 = arith.constant 0 : index
      %12 = vector.load %arg6[%c0_8, %c0_9] : memref<8x16xf32, #tpu.memory_space<vmem>>, vector<8x16xf32>
      tpu.vector_store %arg6[%c0_8, %c0_9], %11 {strides = array<i32>} : memref<8x16xf32, #tpu.memory_space<vmem>>, vector<8x16xf32>,
    } else {
    }
    %c0_i32_4 = arith.constant 0 : i32
    %6 = arith.cmpi sgt, %arg2, %c0_i32_4 : i32
    %7 = arith.extui %6 : i1 to i32
    %c0_i32_5 = arith.constant 0 : i32
    %8 = arith.cmpi ne, %7, %c0_i32_5 : i32
    scf.if %8 {
      %c0_6 = arith.constant 0 : index
      %c0_7 = arith.constant 0 : index
      %9 = vector.load %arg6[%c0_6, %c0_7] : memref<8x16xf32, #tpu.memory_space<vmem>>, vector<8x16xf32>
      %10 = arith.addf %9, %2 : vector<8x16xf32>
      %c0_8 = arith.constant 0 : index
      %c0_9 = arith.constant 0 : index
      %11 = vector.load %arg6[%c0_8, %c0_9] : memref<8x16xf32, #tpu.memory_space<vmem>>, vector<8x16xf32>
      tpu.vector_store %arg6[%c0_8, %c0_9], %10 {strides = array<i32>} : memref<8x16xf32, #tpu.memory_space<vmem>>, vector<8x16xf32>,
    } else {
    }
    return
  }
  func.func @transform_0(%arg0: i32, %arg1: i32, %arg2: i32) -> (i32, i32) {
    %c0_i32 = arith.constant 0 : i32
    return %arg0, %arg2 : i32, i32
  }
  func.func @transform_1(%arg0: i32, %arg1: i32, %arg2: i32) -> (i32, i32) {
    %c0_i32 = arith.constant 0 : i32
    return %arg2, %arg1 : i32, i32
  }
  func.func @transform_2(%arg0: i32, %arg1: i32, %arg2: i32) -> (i32, i32) {
    %c0_i32 = arith.constant 0 : i32
    %c0_i32_0 = arith.constant 0 : i32
    return %c0_i32, %arg1 : i32, i32
  }
  func.func @transform_3(%arg0: i32, %arg1: i32, %arg2: i32) -> (i32, i32) {
    %c0_i32 = arith.constant 0 : i32
    return %arg0, %arg1 : i32, i32
  }
}

</mosaic_0001>

<bundles_post_ra>
// kernel: tpu_custom_call.1
= control target key start
LH: loop header
LB: loop body
LE: loop exit
PB: predicated region body
PF: predicated region fallthrough
CT: control target
= control target key end

     0   :  { %v182_v3 = vmov 0.0|0.0   ;;  %vm183_vm0 = vmmov 0   ;;  %v184_v6 = vmov 0.0   ;;  %s236_s0 = inlined_call_operand.vmem [shape: f32[8,32], index: 0, kind: input, shape index: {}]   ;;  %s237_s1 = inlined_call_operand.vmem [shape: f32[32,16], index: 1, kind: input, shape index: {}]   ;;  %s238_s2 = inlined_call_operand.vmem [shape: f32[1,16], index: 2, kind: input, shape index: {}]   ;;  %s239_s3 = inlined_call_operand.hbm [shape: f32[8,16], index: 3, kind: output, shape index: {}]  }
   0x1   :  { %v16_v0 = vld [vmem:[%s237_s1] sm:$0xff]  ;;  %v17_v1 = vld [vmem:[%s237_s1 + $0x8] sm:$0xff]  ;;  %v18_v2 = vld [vmem:[%s237_s1 + $0x10] sm:$0xff]  ;;  %148 = vmatprep.subr.bf16.mxu0 %v182_v3  ;;  %145 = vmatprep.mubr.msk.f32.mxu0 %vm183_vm0, %v184_v6 }
   0x2   :  { %v149_v4 = vpack.c.bf16 %v17_v1, %v16_v0  ;;  %v19_v5 = vld [vmem:[%s237_s1 + $0x18] sm:$0xff] }
   0x3   :  { %8 = vsyncpa [#allocation3], 0  ;;  %v152_v7 = vpack.c.bf16 %v19_v5, %v18_v2  ;;  %v15_v8 = vld [vmem:[%s236_s0] sm:$0xff]  ;;  %vm20_vm1 = vcmask 261120   ;;  %s185_s24 = smov [#allocation2]   ;;  %vm106_vm2 = vcmask 130048  }
   0x4   :  { %150 = vmatpush3.bf16.msra.mxu0 %v149_v4  ;;  %v131_v9 = vld [vmem:[%s238_s2] ss:$0 sm:$0xff]  ;;  %s122_s1 = sshll.u32 %s185_s24, 4  ;;  %s123_s1 = int_to_ptr.vmem [resolvable:$true] %s122_s1 }
   0x5   :  { %151 = vmatprep.subr.bf16.mxu0 %v182_v3  ;;  %s158_s25 = scalar_lea.vmem %s123_s1, 128  ;;  %p163_p1 = scmp.lt.s32.totalorder %s123_s1, %s123_s1 }
   0x6   :  { %p159_p0 = scmp.ne.s32.totalorder %s123_s1, %s158_s25  ;;  %p164_p2 = scmp.lt.s32.totalorder %s158_s25, %s158_s25 }
   0x8   :  { %153 = vmatpush3.bf16.msra.mxu0 %v152_v7  ;;  %p165_p3 = por %p164_p2, %p163_p1 }
   0xa   :  { %p166_p4 = pnand %p165_p3, %p159_p0 }
   0xb   :  { %146 = vmatmul.mubr.msk.f32.vlgmr.msra.gmra.mrb[0].mxu0 %vm20_vm1, %v15_v8 }
  0xde   :  { %v90_v10 = vpop.f32.mrb[0].mxu0 }
  0xdf   :  { %v105_v11 = vadd.f32 %v131_v9, %v90_v10  ;;  %v147_v12 = vpop.f32.mrb[1].mxu0 }
  0xe1   :  { %107 = vst.msk [vmem:[#allocation2] sm:$0xff] %vm106_vm2, %v105_v11 }
  0xe2   :  { %169 = shalt.err (!%p166_p4)
}
  0xe3   :  { %s170_s27 = scalar_lea.hbm %s239_s3, 128 }
  0xe4   :  { %p171_p5 = scmp.ne.s32.totalorder %s239_s3, %s170_s27  ;;  %p174_p6 = scmp.lt.u32.totalorder %s170_s27, %s239_s3 }
  0xe6   :  { %p176_p7 = pnand %p174_p6, %p171_p5 }
  0xe8   :  { %179 = shalt.err (!%p176_p7)
}
  0xe9   :  { %125 = dma.vmem_to_hbm [thread:$0]  %s123_s1, 128, %s239_s3, [#allocation3]  }
  0xea   :  { %180 = dma.done.wait [#allocation3], 128  }
  0xeb   :  { %181 = vsyncadd [#allocation3], 4294967168 }
  0xec   :  { %129 = vsyncpa [#allocation3], 1 }

</bundles_post_ra>
